<compile_context>
chip_gen: v6e
topology: v6e:2x2x1
jax: 0.10.0
libtpu: 0.0.40
codegen_flags: <defaults>
</compile_context>

<pallas_src>
import numpy as np
import jax
import jax.numpy as jnp
from jax.experimental import pallas as pl
from jax.experimental.pallas import tpu as pltpu

_COMPUTE_DTYPE = jnp.bfloat16   # MXU-native; accumulation stays float32


# ---------------------------------------------------------------------------
# Trace-time constants (numpy)
# ---------------------------------------------------------------------------
def _bilinear_matrix_align_corners(in_size: int, out_size: int) -> np.ndarray:
    """(out_size, in_size) interpolation matrix of nn.UpsamplingBilinear2d (align_corners=True)."""
    if out_size == 1 or in_size == 1:
        src = np.zeros((out_size,), np.float64)
    else:
        src = np.arange(out_size, dtype=np.float64) * (in_size - 1) / (out_size - 1)
    lo = np.clip(np.floor(src).astype(np.int64), 0, in_size - 1)
    hi = np.minimum(lo + 1, in_size - 1)
    frac = src - lo
    m = np.zeros((out_size, in_size), np.float32)
    m[np.arange(out_size), lo] += (1.0 - frac).astype(np.float32)
    m[np.arange(out_size), hi] += frac.astype(np.float32)
    return m


def _upsample_kron_t(h, w, oh, ow):
    """(H*W, OH*OW) matrix so that  up_flat = x_flat @ kron_t  is the bilinear upsample."""
    ah = _bilinear_matrix_align_corners(h, oh)          # (OH, H)
    aw = _bilinear_matrix_align_corners(w, ow)          # (OW, W)
    k = np.einsum("oh,pw->ophw", ah, aw).reshape(oh * ow, h * w)
    return jnp.asarray(k.T)                             # (H*W, OH*OW) float32


def _conv_border_masks(oh, ow):
    """(9, OH*OW) 0/1 masks implementing the zero padding of a 3x3 'same' conv."""
    hh, ww = np.divmod(np.arange(oh * ow), ow)
    m = np.zeros((9, oh * ow), np.float32)
    for dh in range(3):
        for dw in range(3):
            valid = np.ones(oh * ow, bool)
            if dh == 0:
                valid &= hh > 0
            if dh == 2:
                valid &= hh < oh - 1
            if dw == 0:
                valid &= ww > 0
            if dw == 2:
                valid &= ww < ow - 1
            m[dh * 3 + dw] = valid
    return jnp.asarray(m)


def _fold_weight(w_hwio, dtype):
    """HWIO (3,3,Cin,Cout) -> (Cout, 9*Cin) im2col weight, tap-major / channel-minor."""
    kh, kw, cin, cout = w_hwio.shape
    return jnp.transpose(w_hwio, (3, 0, 1, 2)).reshape(cout, kh * kw * cin).astype(dtype)


def _select_upsample_scale(x_shape, skip_shape, img_size):
    """Mimic the try/except in DecoderBlock.forward: up_skip if compatible, else up (x2)."""
    _, _, h, w = x_shape
    if skip_shape is None:
        return 2
    c_skip, sh, sw = skip_shape[1], skip_shape[2], skip_shape[3]
    s = (c_skip * img_size) // 65536
    if s >= 1 and sh == h * s and sw == w * s:
        return s
    return 2


# ---------------------------------------------------------------------------
# Fused kernel: upsample + concat + (conv3x3 + BN + ReLU) x 2, one image per grid step.
# ---------------------------------------------------------------------------
def _make_decoder_kernel(c_in, ow, has_skip):

    def _conv3x3_bn_relu(feat, masks, w_ref, s_ref, b_ref):
        # feat: (Cin, OHW) f32.  Build the (9*Cin, OHW) im2col matrix with XLU rolls +
        # border masks (== zero padding), then ONE MXU matmul (bf16 inputs, f32 acc).
        ohw = feat.shape[1]
        cols = []
        for dh in range(3):
            for dw in range(3):
                t = dh * 3 + dw
                sft = (dh - 1) * ow + (dw - 1)
                piece = feat if sft == 0 else pltpu.roll(feat, shift=(-sft) % ohw, axis=1)
                cols.append(piece * masks[t:t + 1, :])
        x_col = jnp.concatenate(cols, axis=0).astype(w_ref.dtype)          # (9*Cin, OHW)
        acc = jnp.dot(w_ref[...], x_col, preferred_element_type=jnp.float32)  # (Cout, OHW)
        return jnp.maximum(acc * s_ref[...] + b_ref[...], 0.0)             # folded BN + ReLU

    if has_skip:
        def kernel(x_ref, skip_ref, kron_ref, masks_ref,
                   w1_ref, s1_ref, b1_ref, w2_ref, s2_ref, b2_ref,
                   o_ref, feat_ref):
            masks = masks_ref[...]
            # bilinear upsample as ONE matmul: (C_in, HW) @ (HW, OHW) -> lane-dense result
            up = jnp.dot(x_ref[0], kron_ref[...], preferred_element_type=jnp.float32)
            # channel concat([up, skip]) done in a VMEM scratch (no HBM round trip)
            feat_ref[0:c_in, :] = up
            feat_ref[c_in:, :] = skip_ref[0].astype(jnp.float32)
            h = _conv3x3_bn_relu(feat_ref[...], masks, w1_ref, s1_ref, b1_ref)
            h = _conv3x3_bn_relu(h, masks, w2_ref, s2_ref, b2_ref)
            o_ref[0] = h.astype(o_ref.dtype)
    else:
        def kernel(x_ref, kron_ref, masks_ref,
                   w1_ref, s1_ref, b1_ref, w2_ref, s2_ref, b2_ref, o_ref):
            masks = masks_ref[...]
            up = jnp.dot(x_ref[0], kron_ref[...], preferred_element_type=jnp.float32)
            h = _conv3x3_bn_relu(up, masks, w1_ref, s1_ref, b1_ref)
            h = _conv3x3_bn_relu(h, masks, w2_ref, s2_ref, b2_ref)
            o_ref[0] = h.astype(o_ref.dtype)

    return kernel


# ---------------------------------------------------------------------------
# Wrapper
# ---------------------------------------------------------------------------
def decoder_block_forward(x_nchw, skip_nchw, params):
    """Pallas implementation of DecoderBlock.forward (NCHW in / NCHW out, eval-mode BN)."""
    n, c_in, h, w = x_nchw.shape
    has_skip = skip_nchw is not None
    c_skip = skip_nchw.shape[1] if has_skip else 0
    scale = _select_upsample_scale(x_nchw.shape,
                                   skip_nchw.shape if has_skip else None,
                                   params["img_size"])
    oh, ow = h * scale, w * scale
    ohw = oh * ow
    c_in1 = c_in + c_skip
    cdt = _COMPUTE_DTYPE

    kron_t = _upsample_kron_t(h, w, oh, ow).astype(cdt)     # (HW, OHW) bf16
    masks = _conv_border_masks(oh, ow)                      # (9, OHW) f32
    w1 = _fold_weight(params["w1"], cdt)                    # (Cout, 9*C_in1) bf16
    w2 = _fold_weight(params["w2"], cdt)                    # (Cout, 9*Cout)  bf16
    c_out = w1.shape[0]
    assert w1.shape[1] == 9 * c_in1, "conv1 weight does not match in+skip channels"
    s1 = params["s1"].reshape(c_out, 1).astype(jnp.float32)
    b1 = params["b1"].reshape(c_out, 1).astype(jnp.float32)
    s2 = params["s2"].reshape(c_out, 1).astype(jnp.float32)
    b2 = params["b2"].reshape(c_out, 1).astype(jnp.float32)

    x_flat = x_nchw.reshape(n, c_in, h * w).astype(cdt)     # free (contiguous) reshape
    inputs = [x_flat]
    in_specs = [pl.BlockSpec((1, c_in, h * w), lambda i: (i, 0, 0))]
    scratch = []
    if has_skip:
        skip_flat = skip_nchw.reshape(n, c_skip, ohw).astype(cdt)
        inputs.append(skip_flat)
        in_specs.append(pl.BlockSpec((1, c_skip, ohw), lambda i: (i, 0, 0)))
        scratch.append(pltpu.VMEM((c_in1, ohw), jnp.float32))
    for arr in (kron_t, masks, w1, s1, b1, w2, s2, b2):
        inputs.append(arr)
        in_specs.append(pl.BlockSpec(arr.shape, lambda i: (0, 0)))

    # TODO(synk): at real TransUNet shapes, add spatial / channel grid axes (halo via the
    # same roll+mask trick), pick 128-/256-aligned channel tiles per chip generation, and
    # keep the conv accumulator in a VMEM scratch with a K ("arbitrary") grid axis.
    out = pl.pallas_call(
        _make_decoder_kernel(c_in, ow, has_skip),
        out_shape=jax.ShapeDtypeStruct((n, c_out, ohw), jnp.float32),
        grid=(n,),
        in_specs=in_specs,
        out_specs=pl.BlockSpec((1, c_out, ohw), lambda i: (i, 0, 0)),
        scratch_shapes=scratch,
        compiler_params=pltpu.CompilerParams(
            dimension_semantics=("parallel",),
            vmem_limit_bytes=32 * 1024 * 1024),
    )(*inputs)
    return out.reshape(n, c_out, oh, ow)                    # free (contiguous) reshape


# ---------------------------------------------------------------------------
# Plain-JAX reference (mirrors the kernel's bf16-in / f32-accumulate strategy).
# ---------------------------------------------------------------------------
def _reference_forward(x, skip, params):
    n, c, h, w = x.shape
    cdt = _COMPUTE_DTYPE
    scale = _select_upsample_scale(x.shape, None if skip is None else skip.shape,
                                   params["img_size"])
    oh, ow = h * scale, w * scale
    kron_t = _upsample_kron_t(h, w, oh, ow).astype(cdt)
    up = jnp.einsum("nci,io->nco", x.reshape(n, c, h * w).astype(cdt), kron_t,
                    preferred_element_type=jnp.float32).reshape(n, c, oh, ow)
    feat = up if skip is None else jnp.concatenate(
        [up, skip.astype(cdt).astype(jnp.float32)], axis=1)

    def cbr(z, w_hwio, s, b):
        zb = jnp.transpose(z, (0, 2, 3, 1)).astype(cdt)               # NCHW -> NHWC, bf16
        y = jax.lax.conv_general_dilated(
            zb, w_hwio.astype(cdt), (1, 1), "SAME",
            dimension_numbers=("NHWC", "HWIO", "NHWC"),
            preferred_element_type=jnp.float32)
        y = jnp.maximum(y * s.reshape(1, 1, 1, -1) + b.reshape(1, 1, 1, -1), 0.0)
        return jnp.transpose(y, (0, 3, 1, 2))

    y = cbr(feat, params["w1"], params["s1"], params["b1"])
    y = cbr(y, params["w2"], params["s2"], params["b2"])
    return y


# ---------------------------------------------------------------------------
# Main
# ---------------------------------------------------------------------------
if __name__ == "__main__":
    key = jax.random.PRNGKey(0)
    ks = jax.random.split(key, 12)

    N, C_in, C_skip, C_out = 2, 4, 4, 8
    H = W = 8
    img_size = 16   # spatial size after the x2 upsample (DecoderBlock img_size)

    x = jax.random.normal(ks[0], (N, C_in, H, W), jnp.float32)
    skip = jax.random.normal(ks[1], (N, C_skip, 2 * H, 2 * W), jnp.float32)

    eps = 1e-5

    def bn_fold(gamma, beta, mean, var):
        s = gamma / jnp.sqrt(var + eps)
        return s, beta - mean * s

    # conv1: Conv2d(C_in+C_skip -> C_out, 3x3, pad=1, bias=False) + BN + ReLU
    w1 = 0.1 * jax.random.normal(ks[2], (3, 3, C_in + C_skip, C_out), jnp.float32)
    g1 = 1.0 + 0.1 * jax.random.normal(ks[3], (C_out,), jnp.float32)
    be1 = 0.1 * jax.random.normal(ks[4], (C_out,), jnp.float32)
    m1 = 0.1 * jax.random.normal(ks[5], (C_out,), jnp.float32)
    v1 = jnp.abs(jax.random.normal(ks[6], (C_out,), jnp.float32)) + 0.5
    s1, b1 = bn_fold(g1, be1, m1, v1)

    # conv2: Conv2d(C_out -> C_out, 3x3, pad=1, bias=False) + BN + ReLU
    w2 = 0.1 * jax.random.normal(ks[7], (3, 3, C_out, C_out), jnp.float32)
    g2 = 1.0 + 0.1 * jax.random.normal(ks[8], (C_out,), jnp.float32)
    be2 = 0.1 * jax.random.normal(ks[9], (C_out,), jnp.float32)
    m2 = 0.1 * jax.random.normal(ks[10], (C_out,), jnp.float32)
    v2 = jnp.abs(jax.random.normal(ks[11], (C_out,), jnp.float32)) + 0.5
    s2, b2 = bn_fold(g2, be2, m2, v2)

    params = dict(img_size=img_size,
                  w1=w1, s1=s1, b1=b1,
                  w2=w2, s2=s2, b2=b2)

    out = jax.block_until_ready(decoder_block_forward(x, skip, params))
    ref = jax.block_until_ready(_reference_forward(x, skip, params))

    assert out.shape == (N, C_out, 2 * H, 2 * W)
    # Tolerance reflects bf16 activations/weights (both paths round at the same points;
    # residual differences come only from f32 accumulation order).
    err = float(jnp.max(jnp.abs(out - ref)))
    assert bool(jnp.allclose(out, ref, atol=3e-2, rtol=3e-2)), f"mismatch, max abs err={err}"

    print("KERNEL_OK")
</pallas_src>

<mosaic_0001>
module attributes {stable_mosaic.version = 11 : i64} {
  func.func @kernel(%arg0: i32, %arg1: memref<1x4x64xbf16, #tpu.memory_space<vmem>>, %arg2: memref<1x4x256xbf16, #tpu.memory_space<vmem>>, %arg3: memref<64x256xbf16, #tpu.memory_space<vmem>>, %arg4: memref<9x256xf32, #tpu.memory_space<vmem>>, %arg5: memref<8x72xbf16, #tpu.memory_space<vmem>>, %arg6: memref<8x1xf32, #tpu.memory_space<vmem>>, %arg7: memref<8x1xf32, #tpu.memory_space<vmem>>, %arg8: memref<8x72xbf16, #tpu.memory_space<vmem>>, %arg9: memref<8x1xf32, #tpu.memory_space<vmem>>, %arg10: memref<8x1xf32, #tpu.memory_space<vmem>>, %arg11: memref<1x8x256xf32, #tpu.memory_space<vmem>>, %arg12: memref<8x256xf32, #tpu.memory_space<vmem>>) attributes {dimension_semantics = [#tpu.dimension_semantics<parallel>], iteration_bounds = array<i64: 2>, scalar_prefetch = 0 : i64, scratch_operands = 1 : i64, tpu.core_type = #tpu.core_type<tc>, window_params = [{transform_indices = @transform_0, window_bounds = array<i64: 1, 4, 64>}, {transform_indices = @transform_1, window_bounds = array<i64: 1, 4, 256>}, {pipeline_mode = #tpu.pipeline_mode<synchronous>, transform_indices = @transform_2, window_bounds = array<i64: 64, 256>}, {pipeline_mode = #tpu.pipeline_mode<synchronous>, transform_indices = @transform_3, window_bounds = array<i64: 9, 256>}, {pipeline_mode = #tpu.pipeline_mode<synchronous>, transform_indices = @transform_4, window_bounds = array<i64: 8, 72>}, {pipeline_mode = #tpu.pipeline_mode<synchronous>, transform_indices = @transform_5, window_bounds = array<i64: 8, 1>}, {pipeline_mode = #tpu.pipeline_mode<synchronous>, transform_indices = @transform_6, window_bounds = array<i64: 8, 1>}, {pipeline_mode = #tpu.pipeline_mode<synchronous>, transform_indices = @transform_7, window_bounds = array<i64: 8, 72>}, {pipeline_mode = #tpu.pipeline_mode<synchronous>, transform_indices = @transform_8, window_bounds = array<i64: 8, 1>}, {pipeline_mode = #tpu.pipeline_mode<synchronous>, transform_indices = @transform_9, window_bounds = array<i64: 8, 1>}, {transform_indices = @transform_10, window_bounds = array<i64: 1, 8, 256>}]} {
    %c0 = arith.constant 0 : index
    %c0_0 = arith.constant 0 : index
    %0 = vector.load %arg4[%c0, %c0_0] : memref<9x256xf32, #tpu.memory_space<vmem>>, vector<9x256xf32>
    %c0_1 = arith.constant 0 : index
    %c0_2 = arith.constant 0 : index
    %c0_3 = arith.constant 0 : index
    %1 = vector.load %arg1[%c0_1, %c0_2, %c0_3] : memref<1x4x64xbf16, #tpu.memory_space<vmem>>, vector<1x4x64xbf16>
    %2 = vector.shape_cast %1 : vector<1x4x64xbf16> to vector<4x64xbf16>
    %c0_4 = arith.constant 0 : index
    %c0_5 = arith.constant 0 : index
    %3 = vector.load %arg3[%c0_4, %c0_5] : memref<64x256xbf16, #tpu.memory_space<vmem>>, vector<64x256xbf16>
    %cst = arith.constant dense<0.000000e+00> : vector<4x256xf32>
    %4 = tpu.matmul %2, %3, %cst {dimension_numbers = #tpu.dot_dimension_numbers<[1], [0], [0], [1], [0, 0, 1, 1], [], []>} : vector<4x64xbf16>, vector<64x256xbf16>, vector<4x256xf32> -> vector<4x256xf32>
    %c0_6 = arith.constant 0 : index
    %c0_7 = arith.constant 0 : index
    %5 = vector.load %arg12[%c0_6, %c0_7] : memref<8x256xf32, #tpu.memory_space<vmem>>, vector<4x256xf32>
    tpu.vector_store %arg12[%c0_6, %c0_7], %4 {strides = array<i32>} : memref<8x256xf32, #tpu.memory_space<vmem>>, vector<4x256xf32>,
    %c0_8 = arith.constant 0 : index
    %c0_9 = arith.constant 0 : index
    %c0_10 = arith.constant 0 : index
    %6 = vector.load %arg2[%c0_8, %c0_9, %c0_10] : memref<1x4x256xbf16, #tpu.memory_space<vmem>>, vector<1x4x256xbf16>
    %7 = vector.shape_cast %6 : vector<1x4x256xbf16> to vector<4x256xbf16>
    %8 = arith.extf %7 : vector<4x256xbf16> to vector<4x256xf32>
    %c4 = arith.constant 4 : index
    %c0_11 = arith.constant 0 : index
    %9 = vector.load %arg12[%c4, %c0_11] : memref<8x256xf32, #tpu.memory_space<vmem>>, vector<4x256xf32>
    tpu.vector_store %arg12[%c4, %c0_11], %8 {strides = array<i32>} : memref<8x256xf32, #tpu.memory_space<vmem>>, vector<4x256xf32>,
    %c0_12 = arith.constant 0 : index
    %c0_13 = arith.constant 0 : index
    %10 = vector.load %arg12[%c0_12, %c0_13] : memref<8x256xf32, #tpu.memory_space<vmem>>, vector<8x256xf32>
    %c17_i32 = arith.constant 17 : i32
    %11 = tpu.dynamic_rotate %10 by %c17_i32 dim 1 : vector<8x256xf32>, i32 -> vector<8x256xf32>
    %12 = vector.extract_strided_slice %0 {offsets = [0, 0], sizes = [1, 256], strides = [1, 1]} : vector<9x256xf32> to vector<1x256xf32>
    %13 = vector.broadcast %12 : vector<1x256xf32> to vector<8x256xf32>
    %14 = arith.mulf %11, %13 : vector<8x256xf32>
    %c16_i32 = arith.constant 16 : i32
    %15 = tpu.dynamic_rotate %10 by %c16_i32 dim 1 : vector<8x256xf32>, i32 -> vector<8x256xf32>
    %16 = vector.extract_strided_slice %0 {offsets = [1, 0], sizes = [1, 256], strides = [1, 1]} : vector<9x256xf32> to vector<1x256xf32>
    %17 = vector.broadcast %16 : vector<1x256xf32> to vector<8x256xf32>
    %18 = arith.mulf %15, %17 : vector<8x256xf32>
    %c15_i32 = arith.constant 15 : i32
    %19 = tpu.dynamic_rotate %10 by %c15_i32 dim 1 : vector<8x256xf32>, i32 -> vector<8x256xf32>
    %20 = vector.extract_strided_slice %0 {offsets = [2, 0], sizes = [1, 256], strides = [1, 1]} : vector<9x256xf32> to vector<1x256xf32>
    %21 = vector.broadcast %20 : vector<1x256xf32> to vector<8x256xf32>
    %22 = arith.mulf %19, %21 : vector<8x256xf32>
    %c1_i32 = arith.constant 1 : i32
    %23 = tpu.dynamic_rotate %10 by %c1_i32 dim 1 : vector<8x256xf32>, i32 -> vector<8x256xf32>
    %24 = vector.extract_strided_slice %0 {offsets = [3, 0], sizes = [1, 256], strides = [1, 1]} : vector<9x256xf32> to vector<1x256xf32>
    %25 = vector.broadcast %24 : vector<1x256xf32> to vector<8x256xf32>
    %26 = arith.mulf %23, %25 : vector<8x256xf32>
    %27 = vector.extract_strided_slice %0 {offsets = [4, 0], sizes = [1, 256], strides = [1, 1]} : vector<9x256xf32> to vector<1x256xf32>
    %28 = vector.broadcast %27 : vector<1x256xf32> to vector<8x256xf32>
    %29 = arith.mulf %10, %28 : vector<8x256xf32>
    %c255_i32 = arith.constant 255 : i32
    %30 = tpu.dynamic_rotate %10 by %c255_i32 dim 1 : vector<8x256xf32>, i32 -> vector<8x256xf32>
    %31 = vector.extract_strided_slice %0 {offsets = [5, 0], sizes = [1, 256], strides = [1, 1]} : vector<9x256xf32> to vector<1x256xf32>
    %32 = vector.broadcast %31 : vector<1x256xf32> to vector<8x256xf32>
    %33 = arith.mulf %30, %32 : vector<8x256xf32>
    %c241_i32 = arith.constant 241 : i32
    %34 = tpu.dynamic_rotate %10 by %c241_i32 dim 1 : vector<8x256xf32>, i32 -> vector<8x256xf32>
    %35 = vector.extract_strided_slice %0 {offsets = [6, 0], sizes = [1, 256], strides = [1, 1]} : vector<9x256xf32> to vector<1x256xf32>
    %36 = vector.broadcast %35 : vector<1x256xf32> to vector<8x256xf32>
    %37 = arith.mulf %34, %36 : vector<8x256xf32>
    %c240_i32 = arith.constant 240 : i32
    %38 = tpu.dynamic_rotate %10 by %c240_i32 dim 1 : vector<8x256xf32>, i32 -> vector<8x256xf32>
    %39 = vector.extract_strided_slice %0 {offsets = [7, 0], sizes = [1, 256], strides = [1, 1]} : vector<9x256xf32> to vector<1x256xf32>
    %40 = vector.broadcast %39 : vector<1x256xf32> to vector<8x256xf32>
    %41 = arith.mulf %38, %40 : vector<8x256xf32>
    %c239_i32 = arith.constant 239 : i32
    %42 = tpu.dynamic_rotate %10 by %c239_i32 dim 1 : vector<8x256xf32>, i32 -> vector<8x256xf32>
    %43 = vector.extract_strided_slice %0 {offsets = [8, 0], sizes = [1, 256], strides = [1, 1]} : vector<9x256xf32> to vector<1x256xf32>
    %44 = vector.broadcast %43 : vector<1x256xf32> to vector<8x256xf32>
    %45 = arith.mulf %42, %44 : vector<8x256xf32>
    %46 = tpu.concatenate %14, %18, %22, %26, %29, %33, %37, %41, %45 in 0 : vector<8x256xf32>, vector<8x256xf32>, vector<8x256xf32>, vector<8x256xf32>, vector<8x256xf32>, vector<8x256xf32>, vector<8x256xf32>, vector<8x256xf32>, vector<8x256xf32> -> vector<72x256xf32>
    %47 = arith.truncf %46 : vector<72x256xf32> to vector<72x256xbf16>
    %c0_14 = arith.constant 0 : index
    %c0_15 = arith.constant 0 : index
    %48 = vector.load %arg5[%c0_14, %c0_15] : memref<8x72xbf16, #tpu.memory_space<vmem>>, vector<8x72xbf16>
    %cst_16 = arith.constant dense<0.000000e+00> : vector<8x256xf32>
    %49 = tpu.matmul %48, %47, %cst_16 {dimension_numbers = #tpu.dot_dimension_numbers<[1], [0], [0], [1], [0, 0, 1, 1], [], []>} : vector<8x72xbf16>, vector<72x256xbf16>, vector<8x256xf32> -> vector<8x256xf32>
    %c0_17 = arith.constant 0 : index
    %c0_18 = arith.constant 0 : index
    %50 = vector.load %arg6[%c0_17, %c0_18] : memref<8x1xf32, #tpu.memory_space<vmem>>, vector<8x1xf32>
    %51 = vector.broadcast %50 : vector<8x1xf32> to vector<8x256xf32>
    %52 = arith.mulf %49, %51 : vector<8x256xf32>
    %c0_19 = arith.constant 0 : index
    %c0_20 = arith.constant 0 : index
    %53 = vector.load %arg7[%c0_19, %c0_20] : memref<8x1xf32, #tpu.memory_space<vmem>>, vector<8x1xf32>
    %54 = vector.broadcast %53 : vector<8x1xf32> to vector<8x256xf32>
    %55 = arith.addf %52, %54 : vector<8x256xf32>
    %cst_21 = arith.constant 0.000000e+00 : f32
    %56 = vector.broadcast %cst_21 : f32 to vector<8x256xf32>
    %57 = arith.maximumf %55, %56 : vector<8x256xf32>
    %c17_i32_22 = arith.constant 17 : i32
    %58 = tpu.dynamic_rotate %57 by %c17_i32_22 dim 1 : vector<8x256xf32>, i32 -> vector<8x256xf32>
    %59 = vector.extract_strided_slice %0 {offsets = [0, 0], sizes = [1, 256], strides = [1, 1]} : vector<9x256xf32> to vector<1x256xf32>
    %60 = vector.broadcast %59 : vector<1x256xf32> to vector<8x256xf32>
    %61 = arith.mulf %58, %60 : vector<8x256xf32>
    %c16_i32_23 = arith.constant 16 : i32
    %62 = tpu.dynamic_rotate %57 by %c16_i32_23 dim 1 : vector<8x256xf32>, i32 -> vector<8x256xf32>
    %63 = vector.extract_strided_slice %0 {offsets = [1, 0], sizes = [1, 256], strides = [1, 1]} : vector<9x256xf32> to vector<1x256xf32>
    %64 = vector.broadcast %63 : vector<1x256xf32> to vector<8x256xf32>
    %65 = arith.mulf %62, %64 : vector<8x256xf32>
    %c15_i32_24 = arith.constant 15 : i32
    %66 = tpu.dynamic_rotate %57 by %c15_i32_24 dim 1 : vector<8x256xf32>, i32 -> vector<8x256xf32>
    %67 = vector.extract_strided_slice %0 {offsets = [2, 0], sizes = [1, 256], strides = [1, 1]} : vector<9x256xf32> to vector<1x256xf32>
    %68 = vector.broadcast %67 : vector<1x256xf32> to vector<8x256xf32>
    %69 = arith.mulf %66, %68 : vector<8x256xf32>
    %c1_i32_25 = arith.constant 1 : i32
    %70 = tpu.dynamic_rotate %57 by %c1_i32_25 dim 1 : vector<8x256xf32>, i32 -> vector<8x256xf32>
    %71 = vector.extract_strided_slice %0 {offsets = [3, 0], sizes = [1, 256], strides = [1, 1]} : vector<9x256xf32> to vector<1x256xf32>
    %72 = vector.broadcast %71 : vector<1x256xf32> to vector<8x256xf32>
    %73 = arith.mulf %70, %72 : vector<8x256xf32>
    %74 = vector.extract_strided_slice %0 {offsets = [4, 0], sizes = [1, 256], strides = [1, 1]} : vector<9x256xf32> to vector<1x256xf32>
    %75 = vector.broadcast %74 : vector<1x256xf32> to vector<8x256xf32>
    %76 = arith.mulf %57, %75 : vector<8x256xf32>
    %c255_i32_26 = arith.constant 255 : i32
    %77 = tpu.dynamic_rotate %57 by %c255_i32_26 dim 1 : vector<8x256xf32>, i32 -> vector<8x256xf32>
    %78 = vector.extract_strided_slice %0 {offsets = [5, 0], sizes = [1, 256], strides = [1, 1]} : vector<9x256xf32> to vector<1x256xf32>
    %79 = vector.broadcast %78 : vector<1x256xf32> to vector<8x256xf32>
    %80 = arith.mulf %77, %79 : vector<8x256xf32>
    %c241_i32_27 = arith.constant 241 : i32
    %81 = tpu.dynamic_rotate %57 by %c241_i32_27 dim 1 : vector<8x256xf32>, i32 -> vector<8x256xf32>
    %82 = vector.extract_strided_slice %0 {offsets = [6, 0], sizes = [1, 256], strides = [1, 1]} : vector<9x256xf32> to vector<1x256xf32>
    %83 = vector.broadcast %82 : vector<1x256xf32> to vector<8x256xf32>
    %84 = arith.mulf %81, %83 : vector<8x256xf32>
    %c240_i32_28 = arith.constant 240 : i32
    %85 = tpu.dynamic_rotate %57 by %c240_i32_28 dim 1 : vector<8x256xf32>, i32 -> vector<8x256xf32>
    %86 = vector.extract_strided_slice %0 {offsets = [7, 0], sizes = [1, 256], strides = [1, 1]} : vector<9x256xf32> to vector<1x256xf32>
    %87 = vector.broadcast %86 : vector<1x256xf32> to vector<8x256xf32>
    %88 = arith.mulf %85, %87 : vector<8x256xf32>
    %c239_i32_29 = arith.constant 239 : i32
    %89 = tpu.dynamic_rotate %57 by %c239_i32_29 dim 1 : vector<8x256xf32>, i32 -> vector<8x256xf32>
    %90 = vector.extract_strided_slice %0 {offsets = [8, 0], sizes = [1, 256], strides = [1, 1]} : vector<9x256xf32> to vector<1x256xf32>
    %91 = vector.broadcast %90 : vector<1x256xf32> to vector<8x256xf32>
    %92 = arith.mulf %89, %91 : vector<8x256xf32>
    %93 = tpu.concatenate %61, %65, %69, %73, %76, %80, %84, %88, %92 in 0 : vector<8x256xf32>, vector<8x256xf32>, vector<8x256xf32>, vector<8x256xf32>, vector<8x256xf32>, vector<8x256xf32>, vector<8x256xf32>, vector<8x256xf32>, vector<8x256xf32> -> vector<72x256xf32>
    %94 = arith.truncf %93 : vector<72x256xf32> to vector<72x256xbf16>
    %c0_30 = arith.constant 0 : index
    %c0_31 = arith.constant 0 : index
    %95 = vector.load %arg8[%c0_30, %c0_31] : memref<8x72xbf16, #tpu.memory_space<vmem>>, vector<8x72xbf16>
    %cst_32 = arith.constant dense<0.000000e+00> : vector<8x256xf32>
    %96 = tpu.matmul %95, %94, %cst_32 {dimension_numbers = #tpu.dot_dimension_numbers<[1], [0], [0], [1], [0, 0, 1, 1], [], []>} : vector<8x72xbf16>, vector<72x256xbf16>, vector<8x256xf32> -> vector<8x256xf32>
    %c0_33 = arith.constant 0 : index
    %c0_34 = arith.constant 0 : index
    %97 = vector.load %arg9[%c0_33, %c0_34] : memref<8x1xf32, #tpu.memory_space<vmem>>, vector<8x1xf32>
    %98 = vector.broadcast %97 : vector<8x1xf32> to vector<8x256xf32>
    %99 = arith.mulf %96, %98 : vector<8x256xf32>
    %c0_35 = arith.constant 0 : index
    %c0_36 = arith.constant 0 : index
    %100 = vector.load %arg10[%c0_35, %c0_36] : memref<8x1xf32, #tpu.memory_space<vmem>>, vector<8x1xf32>
    %101 = vector.broadcast %100 : vector<8x1xf32> to vector<8x256xf32>
    %102 = arith.addf %99, %101 : vector<8x256xf32>
    %cst_37 = arith.constant 0.000000e+00 : f32
    %103 = vector.broadcast %cst_37 : f32 to vector<8x256xf32>
    %104 = arith.maximumf %102, %103 : vector<8x256xf32>
    %c0_38 = arith.constant 0 : index
    %c0_39 = arith.constant 0 : index
    %c0_40 = arith.constant 0 : index
    %105 = vector.load %arg11[%c0_38, %c0_39, %c0_40] : memref<1x8x256xf32, #tpu.memory_space<vmem>>, vector<1x8x256xf32>
    %106 = vector.shape_cast %105 : vector<1x8x256xf32> to vector<8x256xf32>
    %107 = vector.shape_cast %104 : vector<8x256xf32> to vector<1x8x256xf32>
    tpu.vector_store %arg11[%c0_38, %c0_39, %c0_40], %107 {strides = array<i32>} : memref<1x8x256xf32, #tpu.memory_space<vmem>>, vector<1x8x256xf32>,
    return
  }
  func.func @transform_0(%arg0: i32) -> (i32, i32, i32) {
    %c0_i32 = arith.constant 0 : i32
    %c0_i32_0 = arith.constant 0 : i32
    %c0_i32_1 = arith.constant 0 : i32
    return %arg0, %c0_i32, %c0_i32_0 : i32, i32, i32
  }
  func.func @transform_1(%arg0: i32) -> (i32, i32, i32) {
    %c0_i32 = arith.constant 0 : i32
    %c0_i32_0 = arith.constant 0 : i32
    %c0_i32_1 = arith.constant 0 : i32
    return %arg0, %c0_i32, %c0_i32_0 : i32, i32, i32
  }
  func.func @transform_2(%arg0: i32) -> (i32, i32) {
    %c0_i32 = arith.constant 0 : i32
    %c0_i32_0 = arith.constant 0 : i32
    %c0_i32_1 = arith.constant 0 : i32
    return %c0_i32, %c0_i32_0 : i32, i32
  }
  func.func @transform_3(%arg0: i32) -> (i32, i32) {
    %c0_i32 = arith.constant 0 : i32
    %c0_i32_0 = arith.constant 0 : i32
    %c0_i32_1 = arith.constant 0 : i32
    return %c0_i32, %c0_i32_0 : i32, i32
  }
  func.func @transform_4(%arg0: i32) -> (i32, i32) {
    %c0_i32 = arith.constant 0 : i32
    %c0_i32_0 = arith.constant 0 : i32
    %c0_i32_1 = arith.constant 0 : i32
    return %c0_i32, %c0_i32_0 : i32, i32
  }
  func.func @transform_5(%arg0: i32) -> (i32, i32) {
    %c0_i32 = arith.constant 0 : i32
    %c0_i32_0 = arith.constant 0 : i32
    %c0_i32_1 = arith.constant 0 : i32
    return %c0_i32, %c0_i32_0 : i32, i32
  }
  func.func @transform_6(%arg0: i32) -> (i32, i32) {
    %c0_i32 = arith.constant 0 : i32
    %c0_i32_0 = arith.constant 0 : i32
    %c0_i32_1 = arith.constant 0 : i32
    return %c0_i32, %c0_i32_0 : i32, i32
  }
  func.func @transform_7(%arg0: i32) -> (i32, i32) {
    %c0_i32 = arith.constant 0 : i32
    %c0_i32_0 = arith.constant 0 : i32
    %c0_i32_1 = arith.constant 0 : i32
    return %c0_i32, %c0_i32_0 : i32, i32
  }
  func.func @transform_8(%arg0: i32) -> (i32, i32) {
    %c0_i32 = arith.constant 0 : i32
    %c0_i32_0 = arith.constant 0 : i32
    %c0_i32_1 = arith.constant 0 : i32
    return %c0_i32, %c0_i32_0 : i32, i32
  }
  func.func @transform_9(%arg0: i32) -> (i32, i32) {
    %c0_i32 = arith.constant 0 : i32
    %c0_i32_0 = arith.constant 0 : i32
    %c0_i32_1 = arith.constant 0 : i32
    return %c0_i32, %c0_i32_0 : i32, i32
  }
  func.func @transform_10(%arg0: i32) -> (i32, i32, i32) {
    %c0_i32 = arith.constant 0 : i32
    %c0_i32_0 = arith.constant 0 : i32
    %c0_i32_1 = arith.constant 0 : i32
    return %arg0, %c0_i32, %c0_i32_0 : i32, i32, i32
  }
}

</mosaic_0001>

<bundles_post_ra>
// kernel: tpu_custom_call.1
= control target key start
LH: loop header
LB: loop body
LE: loop exit
PB: predicated region body
PF: predicated region fallthrough
CT: control target
= control target key end

     0   :  { %s1806_s0 = inlined_call_operand.hbm [shape: bf16[2,4,64], index: 0, kind: input, shape index: {}]   ;;  %s1807_s1 = inlined_call_operand.vmem [shape: bf16[2,4,256], index: 1, kind: input, shape index: {}]   ;;  %s1808_s2 = inlined_call_operand.hbm [shape: bf16[64,256], index: 2, kind: input, shape index: {}]   ;;  %s1809_s3 = inlined_call_operand.vmem [shape: f32[9,256], index: 3, kind: input, shape index: {}]   ;;  %s1810_s4 = inlined_call_operand.hbm [shape: bf16[8,72], index: 4, kind: input, shape index: {}]   ;;  %s1811_s5 = inlined_call_operand.vmem [shape: f32[8,1], index: 5, kind: input, shape index: {}]   ;;  %s1812_s6 = inlined_call_operand.vmem [shape: f32[8,1], index: 6, kind: input, shape index: {}]   ;;  %s1813_s7 = inlined_call_operand.vmem [shape: bf16[8,72], index: 7, kind: input, shape index: {}]   ;;  %s1814_s8 = inlined_call_operand.vmem [shape: f32[8,1], index: 8, kind: input, shape index: {}]   ;;  %s1815_s9 = inlined_call_operand.vmem [shape: f32[8,1], index: 9, kind: input, shape index: {}]   ;;  %s1816_s10 = inlined_call_operand.hbm [shape: f32[2,8,256], index: 10, kind: output, shape index: {}]  }
   0x1   :  { %1824 = sst [smem:[#allocation16_spill]] %s1808_s2 }
   0x2   :  { %1825 = sst [smem:[#allocation17_spill]] %s1810_s4 }
   0x3   :  { %15 = vsyncpa [#allocation4], 0 }
   0x4   :  { %17 = vsyncpa [#allocation4 + $0x1], 0 }
   0x5   :  { %18 = vsyncpa [#allocation7], 0 }
   0x6   :  { %19 = vsyncpa [#allocation5], 0 }
   0x7   :  { %21 = vsyncpa [#allocation5 + $0x1], 0  ;;  %s1372_s13 = smov 0   ;;  %s1374_s14 = smov 0  }
   0x8   :  { %s1376_s15 = smov 0   ;;  %s1378_s16 = smov 0  }
   0x9 LB: > { %1826 = sst [smem:[#allocation13_spill]] %s1296_s15  ;;  %s1393_s17 = sadd.s32 4294967295, %s1300_s16   ;;  %s1300_s16 = sphi %s1378_s16, %s1845_s16   ;;  %s1296_s15 = sphi %s1376_s15, %s1847_s15   ;;  %s1292_s14 = sphi %s1374_s14, %s1849_s14   ;;  %s1288_s13 = sphi %s1372_s13, %s1848_s13  }
   0xa   : > { %s1024_s18 = sadd.s32 4294967294, %s1300_s16   ;;  %p47_p0 = scmp.ne.s32.totalorder %s1292_s14, %s1288_s13 }
   0xb   : > { %p1817_p1 = scmp.eq.s32.totalorder %s1393_s17, 0  ;;  %p271_p3 = scmp.eq.s32.totalorder %s1024_s18, 1 }
   0xc   : > { %p1025_p5 = scmp.ge.s32.totalorder %s1300_s16, 1  ;;  %p278_p7 = scmp.lt.s32.totalorder %s1300_s16, 3 }
   0xd   : > { %p1402_p4 = por %p1817_p1, %p47_p0  ;;  %p1407_p6 = por %p271_p3, %p47_p0 }
   0xe   : > { %p1412_p8 = pnand %p1025_p5, %p278_p7  ;;  %s1302_s22 = smov [#allocation6]  }
   0xf   : > { %s1827_s19 = scalar_select %p1402_p4, 1, 0 }
  0x10   : > { %s1828_s20 = scalar_select %p1407_p6, 1, 0 }
  0x11   : > { %s1829_s21 = scalar_select %p1412_p8, 1, 0 }
  0x12   : > { %s290_s23 = sshll.u32 %s1302_s22, 4  ;;  %p1072_p9 = pneg %p1412_p8  ;;  %s291_s23 = int_to_ptr.vmem [resolvable:$true] %s290_s23 }
  0x13   : > { %s1303_s25 = smov [#allocation8]   ;;  %s1163_s27 = scalar_lea.vmem %s291_s23, 1024 }
  0x14   : > { %p1421_p11 = pnand %p1072_p9, %p1817_p1  ;;  %s307_s26 = sshll.u32 %s1303_s25, 4  ;;  %s308_s26 = int_to_ptr.vmem [resolvable:$true] %s307_s26 }
  0x15   : > { %p1164_p13 = scmp.ne.s32.totalorder %s291_s23, %s1163_s27  ;;  %p1171_p5 = scmp.lt.s32.totalorder %s291_s23, %s291_s23 }
  0x16   : > { %p1154_p12 = pneg %p1421_p11  ;;  %p1172_p7 = scmp.lt.s32.totalorder %s1163_s27, %s1163_s27 }
  0x18   : > { %p1166_p0 = pnand %p1164_p13, %p1154_p12  ;;  %p1173_p10 = por %p1172_p7, %p1171_p5 }
  0x1a   : > { %p1167_p3 = pneg %p1166_p0 }
  0x1c   : > { %p1174_p9 = pnand %p1173_p10, %p1167_p3 }
  0x1e   : > { %1177 = shalt.err (!%p1174_p9)
}
  0x1f   : > { %s1304_s28 = smov 128   ;;  %s1305_s29 = smov 8  }
  0x20   : > { %s1831_s2 = sld [smem:[#allocation16_spill]]  ;;  %s1189_s12 = scalar_lea.vmem %s308_s26, 64 }
  0x21   : > { %p1190_p1 = scmp.ne.s32.totalorder %s308_s26, %s1189_s12  ;;  %p1197_p2 = scmp.lt.s32.totalorder %s308_s26, %s308_s26 }
  0x22   : > { %p1198_p6 = scmp.lt.s32.totalorder %s1189_s12, %s1189_s12 }
  0x23   : > { %p1192_p13 = pnand %p1190_p1, %p1154_p12 }
  0x24   : > { %p1199_p5 = por %p1198_p6, %p1197_p2 }
  0x25   : > { %p1193_p0 = pneg %p1192_p13 }
  0x26   : > { %1075 = dma.hbm_to_vmem [thread:$0]  (!%p1421_p11), %s1831_s2, 1024, %s291_s23, [#allocation7], %s1304_s28, %s1304_s28, %s1305_s29  }
  0x27   : > { %p1200_p10 = pnand %p1199_p5, %p1193_p0 }
  0x29   : > { %1203 = shalt.err (!%p1200_p10)
}
  0x2a   : > { %s1832_s4 = sld [smem:[#allocation17_spill]]  ;;  %s1444_s23 = sadd.s32 1, %s1300_s16  }
  0x2b   : > { %1833 = sst [smem:[#allocation14_spill]] %s1444_s23  ;;  %s34_s25 = sadd.s32 1, %s1296_s15 }
  0x2c   : > { %s31_s24 = ssub.s32 %s1300_s16, %s1444_s23  ;;  %p41_p1 = scmp.ne.s32.totalorder %s1296_s15, %s1292_s14 }
  0x2d   : > { %p32_p2 = scmp.eq.s32.totalorder %s31_s24, 0  ;;  %p42_p6 = scmp.eq.s32.totalorder %s1300_s16, 0 }
  0x2e   : > { %p1834_p12 = scmp.eq.s32.totalorder %s1393_s17, 1  ;;  %p1089_p7 = scmp.lt.s32.totalorder %s1300_s16, 2 }
  0x2f   : > { %s1460_s28 = scalar_select %p32_p2, %s1296_s15, %s34_s25  }
  0x30   : > { %1078 = dma.hbm_to_vmem [thread:$0]  (!%p1421_p11), %s1832_s4, 64, %s308_s26, [#allocation7]  }
  0x31   : > { %p1454_p3 = por %p1834_p12, %p41_p1  ;;  %1836 = sst [smem:[#allocation15_spill]] %s1460_s28 }
  0x32   : > { %p43_p9 = por %p42_p6, %p41_p1  ;;  %s333_s29 = sand.u32 1, %s1296_s15  }
  0x33   : > { %s1835_s27 = scalar_select %p1454_p3, 1, 0 }
  0x34   : > { %s1029_s30 = sshll.u32 %s333_s29, 1  ;;  %s1030_s26 = sshll.u32 %s1300_s16, 5 }
  0x35   : > { %s1467_s18 = scalar_lea.hbm %s1806_s0, %s1030_s26  ;;  %s337_s22 = scalar_lea.vmem [#allocation3], %s1029_s30 }
  0x36   : > { %s344_s24 = sshll.u32 %s337_s22, 4  ;;  %p1469_p11 = pnand %p1089_p7, %p43_p9  ;;  %s345_s24 = int_to_ptr.vmem [resolvable:$true] %s344_s24 }
  0x37   : > { %s334_s25 = scalar_lea.sflag [#allocation4], %s333_s29  ;;  %s1204_s4 = scalar_lea.hbm %s1467_s18, 32 }
  0x38   : > { %p1205_p13 = scmp.ne.s32.totalorder %s1467_s18, %s1204_s4  ;;  %p1206_p0 = pneg %p1469_p11 }
  0x39   : > { %s1209_s12 = scalar_lea.hbm %s1806_s0, 64  ;;  %p1210_p1 = scmp.lt.s32.totalorder %s1467_s18, %s1806_s0 }
  0x3a   : > { %p1207_p5 = pnand %p1206_p0, %p1205_p13  ;;  %p1211_p2 = scmp.lt.s32.totalorder %s1209_s12, %s1204_s4 }
  0x3c   : > { %p1208_p10 = pneg %p1207_p5  ;;  %p1212_p6 = por %p1211_p2, %p1210_p1 }
  0x3e   : > { %p1213_p12 = pnand %p1212_p6, %p1208_p10 }
  0x40   : > { %1216 = shalt.err (!%p1213_p12)
}
  0x41   : > { %s1217_s22 = scalar_lea.vmem %s345_s24, 32  ;;  %s1306_s29 = smov [#allocation3]  }
  0x42   : > { %p1218_p7 = scmp.ne.s32.totalorder %s345_s24, %s1217_s22  ;;  %s1222_s15 = sshll.u32 %s1306_s29, 4  ;;  %s1223_s15 = int_to_ptr.vmem [resolvable:$false] %s1222_s15 }
  0x43   : > { %s1224_s23 = scalar_lea.vmem %s1223_s15, 64  ;;  %p1225_p13 = scmp.lt.s32.totalorder %s345_s24, %s1223_s15 }
  0x44   : > { %p1220_p9 = pnand %p1218_p7, %p1206_p0  ;;  %p1226_p5 = scmp.lt.s32.totalorder %s1224_s23, %s1217_s22 }
  0x46   : > { %p1221_p3 = pneg %p1220_p9  ;;  %p1227_p4 = por %p1226_p5, %p1225_p13 }
  0x48   : > { %p1228_p8 = pnand %p1227_p4, %p1221_p3 }
  0x4a   : > { %1231 = shalt.err (!%p1228_p8)
}
  0x4b   : > { %1082 = dma.hbm_to_vmem [thread:$0]  (!%p1469_p11), %s1467_s18, 32, %s345_s24, %s334_s25  }
  0x4c   : > { %p1838_p10 = scmp.ne.s32.totalorder %s1829_s21, 0 }
  0x4d   : > { %s1490_s4 = sand.u32 (!%p1838_p10), 1, %s1292_s14   ;;  %p1839_p0 = scmp.ne.s32.totalorder (!%p1838_p10), %s1827_s19, 0 }
  0x4e   : > { %361 = sbr.rel (%p1838_p10) target bundleno = 1026 (0x402), region = 60  ;;  %s1032_s28 = sshll.u32 (!%p1838_p10), %s1490_s4, 1 }
  0x4f   : > { %s364_s26 = scalar_lea.sflag (!%p1838_p10), [#allocation4], %s1490_s4  ;;  %s367_s15 = scalar_lea.vmem (!%p1838_p10), [#allocation3], %s1032_s28 }
  0x53   : > { %1275 = dma.done.wait (%p1839_p0), %s364_s26, 32  }
  0x54   : > { %1277 = vsyncadd (%p1839_p0), %s364_s26, 4294967264  ;;  %p1840_p4 = scmp.eq.s32.totalorder %s1393_s17, 0 }
  0x56   : > { %1279 = dma.done.wait (%p1840_p4), [#allocation7], 1088   ;;  %p1841_p8 = pmov %p1840_p4 }
  0x57   : > { %v1307_v0 = vmov 0   ;;  %v1140_v1 = vld [vmem:[#allocation6 + $0x34] ss:$8 sps:$4 sm:$0xff]   ;;  %v1142_v2 = vld [vmem:[#allocation6 + $0x30] ss:$8 sps:$4 sm:$0xff]   ;;  %vm476_vm0 = vcmask 523264   ;;  %v536_v23 = vlaneseq }
  0x58   : > { %1281 = vsyncadd (%p1841_p8), [#allocation7], 4294966208  ;;  %512 = vmatprep.mubr.bf16.mxu0 %v1307_v0  ;;  %734 = vmatprep.mubr.bf16.mxu1 %v1307_v0  ;;  %v1143_v3 = vld [vmem:[#allocation6 + $0x24] ss:$8 sps:$4 sm:$0xff]   ;;  %v1145_v4 = vld [vmem:[#allocation6 + $0x20] ss:$8 sps:$4 sm:$0xff]  }
  0x59   : > { %1138 = vset.pattern.permute.xlu0 %v1307_v0  ;;  %1139 = vset.pattern.permute.xlu1 %v1307_v0  ;;  %v1146_v5 = vld [vmem:[#allocation6 + $0x14] ss:$8 sps:$4 sm:$0xff]   ;;  %v1148_v6 = vld [vmem:[#allocation6 + $0x10] ss:$8 sps:$4 sm:$0xff]   ;;  %v1149_v7 = vld [vmem:[#allocation6 + $0x4] ss:$8 sps:$4 sm:$0xff]  }
  0x5a   : > { %488 = vmatprep.subr.bf16.mxu0 %v1140_v1  ;;  %v1151_v8 = vld [vmem:[#allocation6] ss:$8 sps:$4 sm:$0xff]   ;;  %v427_v9 = vld [vmem:[%s367_s15] sm:$0x3]  ;;  %p417_p3 = scmp.lt.s32.totalorder %s1393_s17, 1  ;;  %s1308_s24 = smov 113  }
  0x5b   : > { %489 = vmatpush1.bf16.msra.mxu0 %v1142_v2  ;;  %s1309_s25 = smov 111   ;;  %s1310_s11 = smov 112   ;;  %v743_v19 = vld [vmem:[%s1811_s5] sm:$0xff]  ;;  %v1549_v25 = vshrl.u32 %v536_v23, 7  ;;  %v1551_v27 = vand.u32 127, %v536_v23  ;;  %v1558_v30 = vld [vmem:[%s1809_s3 + $0x8] sm:$0xff] }
  0x5c   : > { %490 = vmatprep.subr.bf16.mxu0 %v1143_v3  ;;  %s418_s2 = scalar_select %p417_p3, %s1393_s17, 1  ;;  %v751_v20 = vld [vmem:[%s1812_s6] sm:$0xff]  ;;  %v1581_v39 = vld [vmem:[%s1809_s3 + $0x10] ss:$0 sm:$0xff]  ;;  %v1586_v40 = vld [vmem:[%s1809_s3 + $0x18] ss:$0 sm:$0xff] }
  0x5d   : > { %s1311_s12 = smov 127   ;;  %s1312_s30 = smov 15   ;;  %v655_v28 = vsub.s32 7, %v1549_v25  ;;  %v638_v29 = vsub.s32 6, %v1549_v25  ;;  %vm650_vm1 = vcmp.lt.s32.totalorder %v1551_v27, 112  ;;  %v621_v33 = vsub.s32 5, %v1549_v25 }
  0x5e   : > { %s1058_s19 = sshll.u32 %s418_s2, 2  ;;  %s1313_s22 = smov 1   ;;  %v604_v34 = vsub.s32 4, %v1549_v25  ;;  %vm633_vm2 = vcmp.lt.s32.totalorder %v1551_v27, 113  ;;  %v1567_v35 = vld [vmem:[%s1809_s3] sm:$0xff]  ;;  %vm667_vm3 = vcmp.lt.s32.totalorder %v1551_v27, 111 }
  0x5f   : > { %491 = vmatpush1.bf16.msra.mxu0 %v1145_v4  ;;  %s421_s18 = scalar_lea.vmem %s1807_s1, %s1058_s19  ;;  %s1314_s29 = smov 17   ;;  %v1570_v36 = vrot.slane %v1558_v30, %v655_v28  ;;  %v1574_v37 = vrot.slane %v1567_v35, %v638_v29  ;;  %v1592_v42 = vrot.slane %v1558_v30, %v638_v29  ;;  %v1595_v43 = vrot.slane %v1567_v35, %v655_v28 }
  0x60   : > { %492 = vmatprep.subr.bf16.mxu0 %v1146_v5  ;;  %v523_v10 = vld [vmem:[%s421_s18] sm:$0xf]  ;;  %s1315_s28 = smov 16   ;;  %v1589_v41 = vrot.slane %v1558_v30, %v604_v34  ;;  %vm616_vm4 = vcmp.lt.s32.totalorder %v1551_v27, 127  ;;  %v1599_v45 = vrot.slane %v1558_v30, %v621_v33  ;;  %v594_v50 = vsub.s32 3, %v1549_v25  ;;  %s909_s19 = scalar_lea.sflag [#allocation5], %s1490_s4 }
  0x61   : > { %v524_v11 = vunpack.c.l.bf16 %v523_v10  ;;  %v1616_v56 = vrot.slane %v1567_v35, %v621_v33  ;;  %v577_v57 = vsub.s32 2, %v1549_v25  ;;  %vm695_vm5 = vcmask 1043456   ;;  %p1842_p1 = scmp.ne.s32.totalorder %s1835_s27, 0 }
  0x62   : > { %vm572_vm6 = vcmp.lt.s32.totalorder %v1551_v27, 15  ;;  %vm589_vm7 = vcmp.lt.s32.totalorder %v1551_v27, 1  ;;  %v1626_v1 = vrot.slane %v1558_v30, %v594_v50  ;;  %v560_v23 = vsub.s32 1, %v1549_v25 }
  0x63   : > { %493 = vmatpush1.bf16.msra.mxu0 %v1148_v6  ;;  %v526_v12 = vcombine.low %v524_v11, %v524_v11  ;;  %529 = vst [vmem:[#allocation2 + $0x8] sm:$0xf0] %v524_v11  ;;  %v1641_v11 = vrot.slane %v1567_v35, %v594_v50  ;;  %vm538_vm8 = vcmp.lt.s32.totalorder %v1551_v27, 17  ;;  %vm555_vm9 = vcmp.lt.s32.totalorder %v1551_v27, 16 }
  0x64   : > { %494 = vmatprep.subr.bf16.mxu0 %v1149_v7  ;;  %v1635_v7 = vrot.slane %v1567_v35, %v604_v34  ;;  %vm691_vm10 = vcmask 588800  }
  0x65   : > { %528 = vst [vmem:[#allocation2] sm:$0xf0] %v526_v12  ;;  %v543_v12 = vsub.s32 0, %v1549_v25 }
  0x67   : > { %495 = vmatpush1.bf16.msra.mxu0 %v1151_v8  ;;  %v1638_v8 = vrot.slane %v1558_v30, %v577_v57  ;;  %v1666_v25 = vrot.slane %v1567_v35, %v543_v12  ;;  %v1669_v33 = vrot.slane %v1558_v30, %v543_v12  ;;  %v888_v12 = vld [vmem:[%s1814_s8] sm:$0xff] }
  0x6a   : > { %1046 = vmatmul.mubr.msk.bf16.vlgmr.msra.gmra.mxu0 %vm476_vm0, %v427_v9 }
  0x6b   : > { %879 = vmatprep.mubr.bf16.mxu0 %v1307_v0 }
 0x12a   : > { %v514_v13 = vpop.f32.mrf.mxu0 }
 0x12b   : > { %521 = vst [vmem:[#allocation2] sm:$0xf] %v514_v13 }
 0x12c   : > { %v516_v14 = vpop.f32.mrf.mxu0 }
 0x12d   : > { %522 = vst [vmem:[#allocation2 + $0x8] sm:$0xf] %v516_v14 }
 0x12e   : > { %v518_v15 = vpop.f32.mrf.mxu0 }
 0x130   : > { %v519_v16 = vpop.f32.mrf.mxu0 }
 0x132   : > { %v1507_v17 = vld [vmem:[#allocation2] sm:$0xff] }
 0x133   : > { %629 = vrot.lane.b32.xlu1 %v1507_v17, %s1308_s24  ;;  %663 = vrot.lane.b32.xlu0 %v1507_v17, %s1309_s25 }
 0x134   : > { %v1513_v18 = vld [vmem:[#allocation2 + $0x8] sm:$0xff] }
 0x135   : > { %v611_v13 = vmul.f32 %v1589_v41, %v1513_v18 }
 0x137   : > { %646 = vrot.lane.b32.xlu0 %v1507_v17, %s1310_s11  ;;  %631 = vrot.lane.b32.xlu1 %v1513_v18, %s1308_s24 }
 0x13b   : > { %612 = vrot.lane.b32.xlu0 %v1507_v17, %s1311_s12  ;;  %648 = vrot.lane.b32.xlu1 %v1513_v18, %s1310_s11 }
 0x13f   : > { %614 = vrot.lane.b32.xlu1 %v1513_v18, %s1311_s12  ;;  %665 = vrot.lane.b32.xlu0 %v1513_v18, %s1309_s25 }
 0x143   : > { %570 = vrot.lane.b32.xlu1 %v1513_v18, %s1312_s30  ;;  %568 = vrot.lane.b32.xlu0 %v1507_v17, %s1312_s30 }
 0x147   : > { %587 = vrot.lane.b32.xlu1 %v1513_v18, %s1313_s22  ;;  %585 = vrot.lane.b32.xlu0 %v1507_v17, %s1313_s22 }
 0x14b   : > { %534 = vrot.lane.b32.xlu1 %v1513_v18, %s1314_s29  ;;  %532 = vrot.lane.b32.xlu0 %v1507_v17, %s1314_s29 }
 0x14f   : > { %553 = vrot.lane.b32.xlu1 %v1513_v18, %s1315_s28  ;;  %551 = vrot.lane.b32.xlu0 %v1507_v17, %s1315_s28  ;;  %v610_v18 = vmul.f32 %v1635_v7, %v1507_v17  ;;  %v1673_v17 = vrot.slane %v1567_v35, %v560_v23 }
 0x153   : > { %746 = vperm.xlu0 %1138, %v743_v19   ;;  %754 = vperm.xlu1 %1139, %v751_v20  }
 0x1a5   : > { %v630_v21 = vpop.permute.xlu1 %629  ;;  %v664_v22 = vpop.permute.xlu0 %663 }
 0x1a9   : > { %v647_v24 = vpop.permute.xlu0 %646  ;;  %v632_v26 = vpop.permute.xlu1 %631 }
 0x1aa   : > { %v635_v47 = vsel %vm633_vm2, %v632_v26, %v630_v21  ;;  %v634_v58 = vsel %vm633_vm2, %v630_v21, %v632_v26 }
 0x1ab   : > { %v645_v59 = vmul.f32 %v1592_v42, %v635_v47  ;;  %v644_v6 = vmul.f32 %v1574_v37, %v634_v58 }
 0x1ad   : > { %v613_v31 = vpop.permute.xlu0 %612  ;;  %v649_v32 = vpop.permute.xlu1 %648 }
 0x1ae   : > { %v652_v38 = vsel %vm650_vm1, %v649_v32, %v647_v24  ;;  %v651_v51 = vsel %vm650_vm1, %v647_v24, %v649_v32  ;;  %v1656_v24 = vrot.slane %v1567_v35, %v577_v57 }
 0x1af   : > { %v662_v52 = vmul.f32 %v1570_v36, %v652_v38  ;;  %v661_v0 = vmul.f32 %v1595_v43, %v651_v51  ;;  %v1676_v38 = vrot.slane %v1558_v30, %v560_v23 }
 0x1b1   : > { %v615_v44 = vpop.permute.xlu1 %614  ;;  %v666_v46 = vpop.permute.xlu0 %665  ;;  %v687_v5 = vpack.c.bf16 %v662_v52, %v645_v59  ;;  %v686_v19 = vpack.c.bf16 %v661_v0, %v644_v6  ;;  %v690_v59 = vld [vmem:[#allocation8] sm:$0xf] }
 0x1b2   : > { %v668_v48 = vsel %vm667_vm3, %v664_v22, %v666_v46  ;;  %v669_v49 = vsel %vm667_vm3, %v666_v46, %v664_v22  ;;  %v618_v55 = vsel %vm616_vm4, %v615_v44, %v613_v31  ;;  %v617_v2 = vsel %vm616_vm4, %v613_v31, %v615_v44 }
 0x1b3   : > { %v678_v53 = vmul.f32 %v1581_v39, %v668_v48  ;;  %v679_v54 = vmul.f32 %v1586_v40, %v669_v49  ;;  %v628_v3 = vmul.f32 %v1599_v45, %v618_v55  ;;  %v627_v14 = vmul.f32 %v1616_v56, %v617_v2 }
 0x1b5   : > { %v571_v60 = vpop.permute.xlu1 %570  ;;  %v569_v61 = vpop.permute.xlu0 %568  ;;  %v689_v62 = vpack.c.bf16 %v679_v54, %v679_v54  ;;  %v688_v63 = vpack.c.bf16 %v678_v53, %v678_v53  ;;  %v685_v22 = vpack.c.bf16 %v628_v3, %v611_v13  ;;  %v684_v34 = vpack.c.bf16 %v627_v14, %v610_v18  ;;  %v896_v13 = vld [vmem:[%s1815_s9] sm:$0xff] }
 0x1b6   : > { %v573_v15 = vsel %vm572_vm6, %v569_v61, %v571_v60  ;;  %v574_v26 = vsel %vm572_vm6, %v571_v60, %v569_v61 }
 0x1b7   : > { %1049 = vmatprep.subr.msk.bf16.mxu1 %vm695_vm5, %v689_v62  ;;  %v697_v4 = vsel %vm695_vm5, %v688_v63, 0  ;;  %v584_v28 = vmul.f32 %v1638_v8, %v573_v15  ;;  %v583_v46 = vmul.f32 %v1656_v24, %v574_v26 }
 0x1b8   : > { %709 = vmatpush1.bf16.msra.mxu1 %v697_v4 }
 0x1b9   : > { %v588_v9 = vpop.permute.xlu1 %587  ;;  %v586_v10 = vpop.permute.xlu0 %585  ;;  %710 = vmatprep.subr.bf16.mxu1 %v687_v5 }
 0x1ba   : > { %v590_v16 = vsel %vm589_vm7, %v586_v10, %v588_v9  ;;  %v591_v20 = vsel %vm589_vm7, %v588_v9, %v586_v10 }
 0x1bb   : > { %v601_v21 = vmul.f32 %v1626_v1, %v590_v16  ;;  %v600_v32 = vmul.f32 %v1641_v11, %v591_v20 }
 0x1bc   : > { %711 = vmatpush1.bf16.msra.mxu1 %v686_v19 }
 0x1bd   : > { %v535_v29 = vpop.permute.xlu1 %534  ;;  %v533_v31 = vpop.permute.xlu0 %532  ;;  %712 = vmatprep.subr.bf16.mxu1 %v685_v22  ;;  %v683_v44 = vpack.c.bf16 %v601_v21, %v584_v28  ;;  %v682_v51 = vpack.c.bf16 %v600_v32, %v583_v46 }
 0x1be   : > { %v539_v47 = vsel %vm538_vm8, %v533_v31, %v535_v29  ;;  %v540_v48 = vsel %vm538_vm8, %v535_v29, %v533_v31 }
 0x1bf   : > { %v549_v52 = vmul.f32 %v1666_v25, %v540_v48  ;;  %v550_v53 = vmul.f32 %v1669_v33, %v539_v47 }
 0x1c0   : > { %713 = vmatpush1.bf16.msra.mxu1 %v684_v34 }
 0x1c1   : > { %v554_v49 = vpop.permute.xlu1 %553  ;;  %v552_v50 = vpop.permute.xlu0 %551  ;;  %714 = vmatprep.subr.bf16.mxu1 %v683_v44 }
 0x1c2   : > { %v556_v35 = vsel %vm555_vm9, %v552_v50, %v554_v49  ;;  %v557_v30 = vsel %vm555_vm9, %v554_v49, %v552_v50 }
 0x1c3   : > { %v566_v54 = vmul.f32 %v1673_v17, %v557_v30  ;;  %v567_v55 = vmul.f32 %v1676_v38, %v556_v35 }
 0x1c4   : > { %715 = vmatpush1.bf16.msra.mxu1 %v682_v51 }
 0x1c5   : > { %v681_v57 = vpack.c.bf16 %v567_v55, %v550_v53  ;;  %v680_v58 = vpack.c.bf16 %v566_v54, %v549_v52 }
 0x1c7   : > { %716 = vmatprep.subr.bf16.mxu1 %v681_v57 }
 0x1c8   : > { %717 = vmatpush1.bf16.msra.mxu1 %v680_v58 }
 0x1cb   : > { %1050 = vmatmul.mubr.msk.bf16.vlgmr.msra.gmra.mxu1 %vm691_vm10, %v690_v59 }
 0x1ce   : > { %v747_v60 = vpop.permute.xlu0 %746  ;;  %v755_v62 = vpop.permute.xlu1 %754 }
 0x28b   : > { %v736_v61 = vpop.f32.mrf.mxu1 }
 0x28c   : > { %v749_v63 = vmul.f32 %v747_v60, %v736_v61 }
 0x28d   : > { %v738_v0 = vpop.f32.mrf.mxu1 }
 0x28e   : > { %v757_v2 = vadd.f32 %v755_v62, %v749_v63  ;;  %v750_v3 = vmul.f32 %v747_v60, %v738_v0 }
 0x28f   : > { %v740_v4 = vpop.f32.mrf.mxu1 }
 0x290   : > { %v759_v5 = vmax.f32 %v757_v2, 0.0  ;;  %v758_v6 = vadd.f32 %v755_v62, %v750_v3 }
 0x291   : > { %v741_v9 = vpop.f32.mrf.mxu1 }
 0x292   : > { %v760_v10 = vmax.f32 %v758_v6, 0.0  ;;  %819 = vrot.lane.b32.xlu1 %v759_v5, %s1309_s25  ;;  %v793_v53 = vmul.f32 %v759_v5, %v1635_v7 }
 0x294   : > { %821 = vrot.lane.b32.xlu0 %v760_v10, %s1309_s25 }
 0x296   : > { %803 = vrot.lane.b32.xlu1 %v759_v5, %s1308_s24 }
 0x298   : > { %805 = vrot.lane.b32.xlu0 %v760_v10, %s1308_s24 }
 0x29a   : > { %811 = vrot.lane.b32.xlu1 %v759_v5, %s1310_s11 }
 0x29c   : > { %813 = vrot.lane.b32.xlu0 %v760_v10, %s1310_s11 }
 0x29e   : > { %795 = vrot.lane.b32.xlu1 %v759_v5, %s1311_s12 }
 0x2a0   : > { %797 = vrot.lane.b32.xlu0 %v760_v10, %s1311_s12 }
 0x2a2   : > { %777 = vrot.lane.b32.xlu1 %v759_v5, %s1312_s30 }
 0x2a4   : > { %779 = vrot.lane.b32.xlu0 %v760_v10, %s1312_s30 }
 0x2a6   : > { %785 = vrot.lane.b32.xlu1 %v759_v5, %s1313_s22 }
 0x2a8   : > { %787 = vrot.lane.b32.xlu0 %v760_v10, %s1313_s22 }
 0x2aa   : > { %761 = vrot.lane.b32.xlu1 %v759_v5, %s1314_s29 }
 0x2ac   : > { %763 = vrot.lane.b32.xlu0 %v760_v10, %s1314_s29  ;;  %s1035_s29 = sshll.u32 %s1490_s4, 4 }
 0x2ad   : > { %s416_s23 = scalar_lea.vmem [#allocation9], %s1035_s29 }
 0x2ae   : > { %769 = vrot.lane.b32.xlu1 %v759_v5, %s1315_s28  ;;  %s923_s18 = sshll.u32 %s416_s23, 4  ;;  %s924_s18 = int_to_ptr.vmem [resolvable:$true] %s923_s18 }
 0x2af   : > { %s1232_s21 = scalar_lea.vmem %s924_s18, 256 }
 0x2b0   : > { %771 = vrot.lane.b32.xlu0 %v760_v10, %s1315_s28  ;;  %s1059_s28 = sshll.u32 %s1393_s17, 8  ;;  %p1233_p11 = scmp.ne.s32.totalorder %s924_s18, %s1232_s21 }
 0x2b1   : > { %s921_s2 = scalar_lea.hbm %s1816_s10, %s1059_s28  ;;  %s1316_s17 = smov [#allocation9]  }
 0x2b2   : > { %891 = vperm.xlu1 %1139, %v888_v12   ;;  %p1234_p2 = pnand %p1233_p11, %p1842_p1  ;;  %s1236_s24 = sshll.u32 %s1316_s17, 4  ;;  %s1237_s24 = int_to_ptr.vmem [resolvable:$false] %s1236_s24 }
 0x2b3   : > { %s1238_s25 = scalar_lea.vmem %s1237_s24, 512  ;;  %p1239_p12 = scmp.lt.s32.totalorder %s924_s18, %s1237_s24 }
 0x2b4   : > { %899 = vperm.xlu0 %1138, %v896_v13   ;;  %p1235_p6 = pneg %p1234_p2  ;;  %p1240_p7 = scmp.lt.s32.totalorder %s1238_s25, %s1232_s21 }
 0x2b6   : > { %p1241_p9 = por %p1240_p7, %p1239_p12 }
 0x2b8   : > { %p1242_p13 = pnand %p1241_p9, %p1235_p6 }
 0x304   : > { %v820_v14 = vpop.permute.xlu1 %819 }
 0x306   : > { %v822_v15 = vpop.permute.xlu0 %821 }
 0x307   : > { %v823_v16 = vsel %vm667_vm3, %v820_v14, %v822_v15  ;;  %v824_v19 = vsel %vm667_vm3, %v822_v15, %v820_v14 }
 0x308   : > { %v825_v20 = vmul.f32 %v1581_v39, %v823_v16  ;;  %v826_v21 = vmul.f32 %v1586_v40, %v824_v19  ;;  %v804_v22 = vpop.permute.xlu1 %803  ;;  %v837_v16 = vld [vmem:[%s1813_s7] sm:$0xf] }
 0x30a   : > { %v835_v23 = vpack.c.bf16 %v825_v20, %v825_v20  ;;  %v836_v18 = vpack.c.bf16 %v826_v21, %v826_v21  ;;  %v806_v26 = vpop.permute.xlu0 %805 }
 0x30b   : > { %v807_v31 = vsel %vm633_vm2, %v804_v22, %v806_v26  ;;  %v808_v32 = vsel %vm633_vm2, %v806_v26, %v804_v22 }
 0x30c   : > { %v812_v28 = vpop.permute.xlu1 %811  ;;  %1051 = vmatprep.subr.msk.bf16.mxu0 %vm695_vm5, %v836_v18  ;;  %v842_v29 = vsel %vm695_vm5, %v835_v23, 0  ;;  %v809_v44 = vmul.f32 %v807_v31, %v1574_v37  ;;  %v810_v46 = vmul.f32 %v808_v32, %v1592_v42 }
 0x30d   : > { %854 = vmatpush1.bf16.msra.mxu0 %v842_v29 }
 0x30e   : > { %v814_v34 = vpop.permute.xlu0 %813 }
 0x30f   : > { %v815_v39 = vsel %vm650_vm1, %v812_v28, %v814_v34  ;;  %v816_v40 = vsel %vm650_vm1, %v814_v34, %v812_v28 }
 0x310   : > { %v817_v47 = vmul.f32 %v815_v39, %v1595_v43  ;;  %v818_v48 = vmul.f32 %v816_v40, %v1570_v36  ;;  %v796_v49 = vpop.permute.xlu1 %795  ;;  %v794_v36 = vmul.f32 %v760_v10, %v1589_v41 }
 0x312   : > { %v833_v50 = vpack.c.bf16 %v817_v47, %v809_v44  ;;  %v798_v35 = vpop.permute.xlu0 %797  ;;  %v834_v30 = vpack.c.bf16 %v818_v48, %v810_v46 }
 0x313   : > { %v799_v51 = vsel %vm616_vm4, %v796_v49, %v798_v35  ;;  %v800_v52 = vsel %vm616_vm4, %v798_v35, %v796_v49 }
 0x314   : > { %v801_v37 = vmul.f32 %v799_v51, %v1616_v56  ;;  %v802_v42 = vmul.f32 %v800_v52, %v1599_v45  ;;  %v778_v54 = vpop.permute.xlu1 %777  ;;  %855 = vmatprep.subr.bf16.mxu0 %v834_v30 }
 0x315   : > { %856 = vmatpush1.bf16.msra.mxu0 %v833_v50 }
 0x316   : > { %v831_v43 = vpack.c.bf16 %v801_v37, %v793_v53  ;;  %v780_v55 = vpop.permute.xlu0 %779  ;;  %v832_v57 = vpack.c.bf16 %v802_v42, %v794_v36 }
 0x317   : > { %v781_v59 = vsel %vm572_vm6, %v778_v54, %v780_v55  ;;  %v782_v7 = vsel %vm572_vm6, %v780_v55, %v778_v54 }
 0x318   : > { %v786_v58 = vpop.permute.xlu1 %785  ;;  %857 = vmatprep.subr.bf16.mxu0 %v832_v57  ;;  %v783_v60 = vmul.f32 %v782_v7, %v1656_v24  ;;  %v784_v61 = vmul.f32 %v781_v59, %v1638_v8 }
 0x319   : > { %858 = vmatpush1.bf16.msra.mxu0 %v831_v43 }
 0x31a   : > { %v788_v56 = vpop.permute.xlu0 %787 }
 0x31b   : > { %v789_v45 = vsel %vm589_vm7, %v786_v58, %v788_v56  ;;  %v790_v41 = vsel %vm589_vm7, %v788_v56, %v786_v58 }
 0x31c   : > { %v791_v62 = vmul.f32 %v790_v41, %v1641_v11  ;;  %v792_v63 = vmul.f32 %v789_v45, %v1626_v1  ;;  %v762_v0 = vpop.permute.xlu1 %761 }
 0x31e   : > { %v829_v2 = vpack.c.bf16 %v791_v62, %v783_v60  ;;  %v764_v3 = vpop.permute.xlu0 %763  ;;  %v830_v4 = vpack.c.bf16 %v792_v63, %v784_v61 }
 0x31f   : > { %v765_v5 = vsel %vm538_vm8, %v762_v0, %v764_v3  ;;  %v766_v6 = vsel %vm538_vm8, %v764_v3, %v762_v0 }
 0x320   : > { %859 = vmatprep.subr.bf16.mxu0 %v830_v4  ;;  %v770_v24 = vpop.permute.xlu1 %769  ;;  %v767_v11 = vmul.f32 %v766_v6, %v1666_v25  ;;  %v768_v10 = vmul.f32 %v765_v5, %v1669_v33 }
 0x321   : > { %860 = vmatpush1.bf16.msra.mxu0 %v829_v2 }
 0x322   : > { %v772_v9 = vpop.permute.xlu0 %771 }
 0x323   : > { %v773_v8 = vsel %vm555_vm9, %v770_v24, %v772_v9  ;;  %v774_v1 = vsel %vm555_vm9, %v772_v9, %v770_v24 }
 0x324   : > { %v775_v12 = vmul.f32 %v774_v1, %v1673_v17  ;;  %v776_v13 = vmul.f32 %v773_v8, %v1676_v38 }
 0x326   : > { %v827_v14 = vpack.c.bf16 %v775_v12, %v767_v11  ;;  %v828_v15 = vpack.c.bf16 %v776_v13, %v768_v10 }
 0x328   : > { %861 = vmatprep.subr.bf16.mxu0 %v828_v15 }
 0x329   : > { %862 = vmatpush1.bf16.msra.mxu0 %v827_v14 }
 0x32c   : > { %1052 = vmatmul.mubr.msk.bf16.vlgmr.msra.gmra.mxu0 %vm691_vm10, %v837_v16 }
 0x32d   : > { %v892_v27 = vpop.permute.xlu1 %891 }
 0x32f   : > { %v900_v33 = vpop.permute.xlu0 %899 }
 0x3ec   : > { %v881_v25 = vpop.f32.mrf.mxu0 }
 0x3ed   : > { %v894_v19 = vmul.f32 %v892_v27, %v881_v25 }
 0x3ee   : > { %v883_v17 = vpop.f32.mrf.mxu0 }
 0x3ef   : > { %v902_v20 = vadd.f32 %v900_v33, %v894_v19  ;;  %v895_v38 = vmul.f32 %v892_v27, %v883_v17 }
 0x3f0   : > { %v885_v21 = vpop.f32.mrf.mxu0 }
 0x3f1   : > { %v904_v22 = vmax.f32 %v902_v20, 0.0  ;;  %v903_v23 = vadd.f32 %v900_v33, %v895_v38 }
 0x3f2   : > { %v886_v18 = vpop.f32.mrf.mxu0 }
 0x3f3   : > { %906 = vst [vmem:[%s416_s23] sm:$0xff] %v904_v22  ;;  %v905_v26 = vmax.f32 %v903_v23, 0.0 }
 0x3f5   : > { %907 = vst [vmem:[%s416_s23 + $0x8] sm:$0xff] %v905_v26 }
 0x3f6   : > { %1245 = shalt.err (!%p1242_p13)
}
 0x3f7   : > { %s1246_s11 = scalar_lea.hbm %s921_s2, 256  ;;  %s1250_s30 = scalar_lea.hbm %s1816_s10, 512 }
 0x3f8   : > { %p1247_p5 = scmp.ne.s32.totalorder %s921_s2, %s1246_s11  ;;  %p1251_p4 = scmp.lt.s32.totalorder %s921_s2, %s1816_s10 }
 0x3f9   : > { %p1252_p8 = scmp.lt.s32.totalorder %s1250_s30, %s1246_s11 }
 0x3fa   : > { %p1248_p10 = pnand %p1247_p5, %p1842_p1 }
 0x3fb   : > { %p1253_p3 = por %p1252_p8, %p1251_p4 }
 0x3fc   : > { %p1249_p0 = pneg %p1248_p10 }
 0x3fe   : > { %p1254_p11 = pnand %p1253_p3, %p1249_p0 }
 0x400   : > { %1257 = shalt.err (!%p1254_p11)
}
 0x401   : > { %1070 = dma.vmem_to_hbm [thread:$0]  (%p1842_p1), %s924_s18, 256, %s921_s2, %s909_s19  }
 0x402 PF: > { %s935_s28 = sand.u32 1, %s1288_s13   ;;  %p1843_p2 = scmp.ne.s32.totalorder %s1828_s20, 0 }
 0x403   : > { %p1844_p6 = scmp.ge.s32.totalorder %s1300_s16, 2  ;;  %s936_s23 = scalar_lea.sflag [#allocation5], %s935_s28 }
 0x405   : > { %p1084_p12 = pnand %p1844_p6, %p1843_p2 }
 0x407   : > { %p1085_p7 = pneg %p1084_p12 }
 0x409   : > { %1283 = dma.done.wait (%p1085_p7), %s936_s23, 256  }
 0x40a   : > { %1285 = vsyncadd (%p1085_p7), %s936_s23, 4294967040  ;;  %s1845_s16 = sld [smem:[#allocation14_spill]]  ;;  %s1848_s13 = smov %s1292_s14 }
 0x40b   : > { %s1846_s26 = sld [smem:[#allocation13_spill]] }
 0x40c   : > { %s1847_s15 = sld [smem:[#allocation15_spill]] }
 0x410   : > { %p24_p9 = scmp.ge.s32.totalorder %s1845_s16, 4  }
 0x411   : > { %s1849_s14 = smov %s1846_s26 }
 0x412   :  { %26 = sbr.rel (!%p24_p9) target bundleno = 9 (0x9), region = 116 }
 0x417   :  { %941 = vsyncpa [#allocation4], 1 }
 0x418   :  { %943 = vsyncpa [#allocation4 + $0x1], 1 }
 0x419   :  { %944 = vsyncpa [#allocation7], 1 }
 0x41a   :  { %945 = vsyncpa [#allocation5], 1 }
 0x41b   :  { %947 = vsyncpa [#allocation5 + $0x1], 1 }

</bundles_post_ra>
